<compile_context>
chip_gen: v7x
topology: tpu7x:2x2x1
jax: 0.10.0
libtpu: 0.0.40
codegen_flags: <defaults>
</compile_context>

<pallas_src>
import jax
import jax.numpy as jnp
import numpy as np
from jax.experimental import pallas as pl
from jax.experimental.pallas import tpu as pltpu


# ---------------------------------------------------------------------------
# Fused kernel: freq mean-pool + Conv1d (im2col via XLU rolls) + BN + ReLU.
# ---------------------------------------------------------------------------
def conv_h_fused_kernel(x_ref, w_ref, shift_ref, out_ref):
    # x_ref:     (B_blk, Ci, F, T)   input block
    # w_ref:     (Co, K*Ci)          conv weight, BN scale folded, col = k*Ci + ci
    # shift_ref: (Co, 1)             folded BN shift (includes conv bias)
    # out_ref:   (B_blk, Co, L)      L = T + 2*(K//2) - K + 1
    B, Ci, F, T = x_ref.shape
    Co, L = out_ref.shape[1], out_ref.shape[2]
    K = w_ref.shape[1] // Ci
    pad = K // 2
    Tp = T + 2 * pad

    # ---- Stage 1 (fused): mean over the freq (sublane) axis, f32 accumulation. ----
    p = jnp.sum(x_ref[...], axis=2, dtype=jnp.float32) * (1.0 / F)        # (B, Ci, T)

    # Append the 2*pad halo zeros once at the end; the cyclic rolls below turn
    # them into Conv1d's left/right zero padding (no host pad, no unaligned copy).
    if pad > 0:
        p = jnp.concatenate(
            [p, jnp.zeros((B, Ci, 2 * pad), jnp.float32)], axis=-1)       # (B, Ci, Tp)

    w = w_ref[...]          # (Co, K*Ci) -- resident across the batch loop
    shift = shift_ref[...]  # (Co, 1)

    # ---- Stage 2 (fused): im2col conv + folded-BN shift + ReLU. ----
    # Static Python loop over the (small) batch block: no per-batch grid steps.
    for b in range(B):
        pb = p[b]                                                          # (Ci, Tp)
        # K shifted views via XLU rotations; view k at column t holds the
        # zero-padded pooled signal at time t + k - pad (wrap lands in zeros).
        shifted = []
        for k in range(K):
            sh = (pad - k) % Tp
            shifted.append(pltpu.roll(pb, shift=sh, axis=1) if sh else pb)
        patches = jnp.concatenate(shifted, axis=0) if K > 1 else shifted[0]  # (K*Ci, Tp)
        acc = jnp.dot(w, patches, preferred_element_type=jnp.float32)        # (Co, Tp)
        y = acc[:, :L] + shift                                               # prefix slice
        out_ref[b] = jnp.maximum(y, 0.0).astype(out_ref.dtype)


def _pick_batch_block(N, bytes_per_batch, budget=20 * 1024 * 1024):
    """Largest divisor of N whose double-buffered block fits the VMEM budget and
    that leaves >= 2 grid steps when N >= 2 (keeps both v7x TensorCores busy)."""
    best = 1
    for cand in range(1, N + 1):
        if N % cand:
            continue
        if N >= 2 and N // cand < 2:
            continue
        if 2 * cand * bytes_per_batch <= budget:
            best = cand
    return best


def conv_h_forward(x, w, b, gamma, beta, running_mean, running_var, eps=1e-5):
    N, Ci, F, T = x.shape
    Co, _, K = w.shape
    pad = K // 2
    L = T + 2 * pad - K + 1

    # ---- Host-side folding: BN scale -> weights; BN shift + conv bias -> shift. ----
    scale = gamma / jnp.sqrt(running_var + eps)                            # (Co,)
    w_scaled = w.astype(jnp.float32) * scale[:, None, None]                # (Co, Ci, K)
    w_mat = jnp.transpose(w_scaled, (0, 2, 1)).reshape(Co, K * Ci)         # col = k*Ci+ci
    shift = (beta + (b - running_mean) * scale).reshape(Co, 1).astype(jnp.float32)

    # ---- Single fused pallas_call, gridded over batch blocks. ----
    itemsize = jnp.dtype(x.dtype).itemsize
    bytes_per_batch = Ci * F * T * itemsize + Co * L * itemsize
    B_blk = _pick_batch_block(N, bytes_per_batch)

    out = pl.pallas_call(
        conv_h_fused_kernel,
        out_shape=jax.ShapeDtypeStruct((N, Co, L), x.dtype),
        grid=(N // B_blk,),
        in_specs=[
            pl.BlockSpec((B_blk, Ci, F, T), lambda n: (n, 0, 0, 0)),
            pl.BlockSpec((Co, K * Ci), lambda n: (0, 0)),   # constant block: no re-DMA
            pl.BlockSpec((Co, 1), lambda n: (0, 0)),
        ],
        out_specs=pl.BlockSpec((B_blk, Co, L), lambda n: (n, 0, 0)),
        compiler_params=pltpu.CompilerParams(
            dimension_semantics=("parallel",),
            vmem_limit_bytes=48 * 1024 * 1024),
    )(x, w_mat, shift)
    return out


# ---------------------------------------------------------------------------
# Pure-JAX reference (eval-mode BN), for correctness checking.
# ---------------------------------------------------------------------------
def conv_h_reference(x, w, b, gamma, beta, running_mean, running_var, eps=1e-5):
    pooled = jnp.mean(x, axis=2)                                           # (N, Ci, T)
    K = w.shape[2]
    y = jax.lax.conv_general_dilated(
        pooled, w, window_strides=(1,), padding=[(K // 2, K // 2)],
        dimension_numbers=('NCH', 'OIH', 'NCH'))
    y = y + b[None, :, None]
    y = (y - running_mean[None, :, None]) / jnp.sqrt(running_var[None, :, None] + eps)
    y = y * gamma[None, :, None] + beta[None, :, None]
    return jnp.maximum(y, 0.0)


if __name__ == "__main__":
    # Small shapes consistent with the module's forward.
    N, Ci, Co, F, T, K = 2, 4, 8, 16, 16, 3

    key = jax.random.PRNGKey(0)
    kx, kw, kb, kg, kbe, km, kv = jax.random.split(key, 7)

    x = jax.random.normal(kx, (N, Ci, F, T), dtype=jnp.float32)

    # Deterministic synthetic parameters (shapes from Conv1d / BatchNorm1d init).
    w = 0.1 * jax.random.normal(kw, (Co, Ci, K), dtype=jnp.float32)
    b = 0.1 * jax.random.normal(kb, (Co,), dtype=jnp.float32)
    gamma = 1.0 + 0.1 * jax.random.normal(kg, (Co,), dtype=jnp.float32)
    beta = 0.1 * jax.random.normal(kbe, (Co,), dtype=jnp.float32)
    running_mean = 0.1 * jax.random.normal(km, (Co,), dtype=jnp.float32)
    running_var = jnp.abs(1.0 + 0.1 * jax.random.normal(kv, (Co,), dtype=jnp.float32))

    out = conv_h_forward(x, w, b, gamma, beta, running_mean, running_var)
    out = jax.block_until_ready(out)

    ref = conv_h_reference(x, w, b, gamma, beta, running_mean, running_var)
    ref = jax.block_until_ready(ref)

    assert out.shape == ref.shape, (out.shape, ref.shape)
    assert np.allclose(np.asarray(out), np.asarray(ref), atol=1e-4, rtol=1e-4)

    print("KERNEL_OK")
</pallas_src>

<mosaic_0001>
module attributes {stable_mosaic.version = 11 : i64} {
  func.func @conv_h_fused_kernel(%arg0: i32, %arg1: memref<1x4x16x16xf32, #tpu.memory_space<vmem>>, %arg2: memref<8x12xf32, #tpu.memory_space<vmem>>, %arg3: memref<8x1xf32, #tpu.memory_space<vmem>>, %arg4: memref<1x8x16xf32, #tpu.memory_space<vmem>>) attributes {dimension_semantics = [#tpu.dimension_semantics<parallel>], iteration_bounds = array<i64: 2>, scalar_prefetch = 0 : i64, scratch_operands = 0 : i64, tpu.core_type = #tpu.core_type<tc>, window_params = [{transform_indices = @transform_0, window_bounds = array<i64: 1, 4, 16, 16>}, {pipeline_mode = #tpu.pipeline_mode<synchronous>, transform_indices = @transform_1, window_bounds = array<i64: 8, 12>}, {pipeline_mode = #tpu.pipeline_mode<synchronous>, transform_indices = @transform_2, window_bounds = array<i64: 8, 1>}, {transform_indices = @transform_3, window_bounds = array<i64: 1, 8, 16>}]} {
    %c0 = arith.constant 0 : index
    %c0_0 = arith.constant 0 : index
    %c0_1 = arith.constant 0 : index
    %c0_2 = arith.constant 0 : index
    %0 = vector.load %arg1[%c0, %c0_0, %c0_1, %c0_2] : memref<1x4x16x16xf32, #tpu.memory_space<vmem>>, vector<1x4x16x16xf32>
    %cst = arith.constant dense<0.000000e+00> : vector<1x4x16xf32>
    %1 = vector.multi_reduction <add>, %0, %cst [2] : vector<1x4x16x16xf32> to vector<1x4x16xf32>
    %cst_3 = arith.constant 6.250000e-02 : f32
    %2 = vector.broadcast %cst_3 : f32 to vector<1x4x16xf32>
    %3 = arith.mulf %1, %2 : vector<1x4x16xf32>
    %cst_4 = arith.constant 0.000000e+00 : f32
    %4 = vector.broadcast %cst_4 : f32 to vector<1x4x2xf32>
    %5 = tpu.concatenate %3, %4 in 2 : vector<1x4x16xf32>, vector<1x4x2xf32> -> vector<1x4x18xf32>
    %c0_5 = arith.constant 0 : index
    %c0_6 = arith.constant 0 : index
    %6 = vector.load %arg2[%c0_5, %c0_6] : memref<8x12xf32, #tpu.memory_space<vmem>>, vector<8x12xf32>
    %c0_7 = arith.constant 0 : index
    %c0_8 = arith.constant 0 : index
    %7 = vector.load %arg3[%c0_7, %c0_8] : memref<8x1xf32, #tpu.memory_space<vmem>>, vector<8x1xf32>
    %8 = vector.shape_cast %5 : vector<1x4x18xf32> to vector<4x18xf32>
    %c1_i32 = arith.constant 1 : i32
    %9 = tpu.dynamic_rotate %8 by %c1_i32 dim 1 : vector<4x18xf32>, i32 -> vector<4x18xf32>
    %c17_i32 = arith.constant 17 : i32
    %10 = tpu.dynamic_rotate %8 by %c17_i32 dim 1 : vector<4x18xf32>, i32 -> vector<4x18xf32>
    %11 = tpu.concatenate %9, %8, %10 in 0 : vector<4x18xf32>, vector<4x18xf32>, vector<4x18xf32> -> vector<12x18xf32>
    %cst_9 = arith.constant dense<0.000000e+00> : vector<8x18xf32>
    %12 = tpu.matmul %6, %11, %cst_9 {dimension_numbers = #tpu.dot_dimension_numbers<[1], [0], [0], [1], [0, 0, 1, 1], [], []>} : vector<8x12xf32>, vector<12x18xf32>, vector<8x18xf32> -> vector<8x18xf32>
    %13 = vector.extract_strided_slice %12 {offsets = [0, 0], sizes = [8, 16], strides = [1, 1]} : vector<8x18xf32> to vector<8x16xf32>
    %14 = vector.broadcast %7 : vector<8x1xf32> to vector<8x16xf32>
    %15 = arith.addf %13, %14 : vector<8x16xf32>
    %cst_10 = arith.constant 0.000000e+00 : f32
    %16 = vector.broadcast %cst_10 : f32 to vector<8x16xf32>
    %17 = arith.maximumf %15, %16 : vector<8x16xf32>
    %c0_11 = arith.constant 0 : index
    %c0_12 = arith.constant 0 : index
    %c0_13 = arith.constant 0 : index
    %18 = vector.load %arg4[%c0_11, %c0_12, %c0_13] : memref<1x8x16xf32, #tpu.memory_space<vmem>>, vector<1x8x16xf32>
    %19 = vector.shape_cast %18 : vector<1x8x16xf32> to vector<8x16xf32>
    %20 = vector.shape_cast %17 : vector<8x16xf32> to vector<1x8x16xf32>
    tpu.vector_store %arg4[%c0_11, %c0_12, %c0_13], %20 {strides = array<i32>} : memref<1x8x16xf32, #tpu.memory_space<vmem>>, vector<1x8x16xf32>,
    return
  }
  func.func @transform_0(%arg0: i32) -> (i32, i32, i32, i32) {
    %c0_i32 = arith.constant 0 : i32
    %c0_i32_0 = arith.constant 0 : i32
    %c0_i32_1 = arith.constant 0 : i32
    %c0_i32_2 = arith.constant 0 : i32
    return %arg0, %c0_i32, %c0_i32_0, %c0_i32_1 : i32, i32, i32, i32
  }
  func.func @transform_1(%arg0: i32) -> (i32, i32) {
    %c0_i32 = arith.constant 0 : i32
    %c0_i32_0 = arith.constant 0 : i32
    %c0_i32_1 = arith.constant 0 : i32
    return %c0_i32, %c0_i32_0 : i32, i32
  }
  func.func @transform_2(%arg0: i32) -> (i32, i32) {
    %c0_i32 = arith.constant 0 : i32
    %c0_i32_0 = arith.constant 0 : i32
    %c0_i32_1 = arith.constant 0 : i32
    return %c0_i32, %c0_i32_0 : i32, i32
  }
  func.func @transform_3(%arg0: i32) -> (i32, i32, i32) {
    %c0_i32 = arith.constant 0 : i32
    %c0_i32_0 = arith.constant 0 : i32
    %c0_i32_1 = arith.constant 0 : i32
    return %arg0, %c0_i32, %c0_i32_0 : i32, i32, i32
  }
}

</mosaic_0001>

<bundles_post_ra>
// kernel: tpu_custom_call.1
= control target key start
LH: loop header
LB: loop body
LE: loop exit
PB: predicated region body
PF: predicated region fallthrough
CT: control target
= control target key end

     0   :  { %8 = vsyncpa [#allocation3], 0  ;;  %s847_s0 = inlined_call_operand.hbm [shape: f32[2,4,16,16], index: 0, kind: input, shape index: {}]   ;;  %s848_s1 = inlined_call_operand.vmem [shape: f32[8,12], index: 1, kind: input, shape index: {}]   ;;  %s849_s2 = inlined_call_operand.vmem [shape: f32[8,1], index: 2, kind: input, shape index: {}]   ;;  %s850_s3 = inlined_call_operand.hbm [shape: f32[2,8,16], index: 3, kind: output, shape index: {}]  }
   0x1   :  { %10 = vsyncpa [#allocation3 + $0x1], 0 }
   0x2   :  { %11 = vsyncpa [#allocation4], 0 }
   0x3   :  { %13 = vsyncpa [#allocation4 + $0x1], 0  ;;  %s668_s12 = smov 0   ;;  %s670_s13 = smov 0  }
   0x4   :  { %s672_s14 = smov 0   ;;  %s674_s15 = smov 0  }
   0x5 LB: > { %s689_s16 = sadd.s32 4294967295, %s633_s15   ;;  %s443_s17 = sadd.s32 4294967294, %s633_s15   ;;  %s633_s15 = sphi %s674_s15, %s863_s15   ;;  %s629_s14 = sphi %s672_s14, %s862_s14   ;;  %s625_s13 = sphi %s670_s13, %s861_s13   ;;  %s621_s12 = sphi %s668_s12, %s860_s12  }
   0x6   : > { %s693_s18 = sadd.s32 1, %s633_s15   ;;  %s26_s19 = sadd.s32 1, %s629_s14 }
   0x7   : > { %s23_s20 = ssub.s32 %s633_s15, %s693_s18  ;;  %p33_p0 = scmp.ne.s32.totalorder %s629_s14, %s625_s13 }
   0x8   : > { %p24_p1 = scmp.eq.s32.totalorder %s23_s20, 0  ;;  %p34_p2 = scmp.eq.s32.totalorder %s633_s15, 0 }
   0x9   : > { %p39_p3 = scmp.ne.s32.totalorder %s625_s13, %s621_s12  ;;  %p40_p4 = scmp.eq.s32.totalorder %s689_s16, 0 }
   0xa   : > { %s705_s21 = scalar_select %p24_p1, %s629_s14, %s26_s19  }
   0xb   : > { %p707_p5 = por %p34_p2, %p33_p0  ;;  %p711_p6 = por %p40_p4, %p39_p3 }
   0xc   : > { %p105_p7 = scmp.eq.s32.totalorder %s689_s16, 1  ;;  %p111_p8 = scmp.eq.s32.totalorder %s443_s17, 1 }
   0xd   : > { %p485_p10 = scmp.lt.s32.totalorder %s633_s15, 2  ;;  %s137_s26 = sand.u32 1, %s629_s14  }
   0xe   : > { %p718_p11 = por %p105_p7, %p33_p0  ;;  %p722_p12 = por %p111_p8, %p39_p3 }
   0xf   : > { %s458_s27 = sshll.u32 %s633_s15, 10  ;;  %s446_s28 = sshll.u32 %s137_s26, 6 }
  0x10   : > { %s854_s24 = scalar_select %p718_p11, 1, 0 }
  0x11   : > { %s855_s25 = scalar_select %p722_p12, 1, 0 }
  0x12   : > { %s731_s4 = scalar_lea.hbm %s847_s0, %s458_s27  ;;  %s141_s5 = scalar_lea.vmem [#allocation2], %s446_s28 }
  0x13   : > { %s148_s6 = sshll.u32 %s141_s5, 4  ;;  %p735_p13 = pnand %p485_p10, %p707_p5  ;;  %s739_s6 = int_to_ptr.vmem [resolvable:$true] %s148_s6 }
  0x14   : > { %s741_s8 = scalar_lea.sflag [#allocation3], %s137_s26  ;;  %s537_s9 = scalar_lea.hbm %s731_s4, 1024 }
  0x15   : > { %p538_p0 = scmp.ne.s32.totalorder %s731_s4, %s537_s9  ;;  %p539_p1 = pneg %p735_p13 }
  0x16   : > { %s542_s17 = scalar_lea.hbm %s847_s0, 2048  ;;  %p543_p4 = scmp.lt.u32.totalorder %s731_s4, %s847_s0 }
  0x17   : > { %p540_p2 = pnand %p539_p1, %p538_p0  ;;  %p544_p5 = scmp.lt.u32.totalorder %s542_s17, %s537_s9 }
  0x18   : > { %p546_p8 = scmp.lt.u32.totalorder %s537_s9, %s731_s4 }
  0x19   : > { %p541_p3 = pneg %p540_p2  ;;  %p545_p7 = por %p544_p5, %p543_p4 }
  0x1b   : > { %p547_p10 = por %p546_p8, %p545_p7 }
  0x1d   : > { %p548_p9 = pnand %p547_p10, %p541_p3 }
  0x1f   : > { %551 = shalt.err (!%p548_p9)
}
  0x20   : > { %s552_s22 = scalar_lea.vmem %s739_s6, 1024  ;;  %s635_s26 = smov [#allocation2]  }
  0x21   : > { %p553_p0 = scmp.ne.s32.totalorder %s739_s6, %s552_s22  ;;  %s557_s27 = sshll.u32 %s635_s26, 4  ;;  %s558_s27 = int_to_ptr.vmem [resolvable:$false] %s557_s27 }
  0x22   : > { %s559_s28 = scalar_lea.vmem %s558_s27, 2048  ;;  %p560_p11 = scmp.lt.s32.totalorder %s739_s6, %s558_s27 }
  0x23   : > { %p555_p2 = pnand %p553_p0, %p539_p1  ;;  %p561_p4 = scmp.lt.s32.totalorder %s559_s28, %s552_s22 }
  0x25   : > { %p556_p12 = pneg %p555_p2  ;;  %p562_p5 = por %p561_p4, %p560_p11 }
  0x27   : > { %p563_p7 = pnand %p562_p5, %p556_p12 }
  0x29   : > { %566 = shalt.err (!%p563_p7)
}
  0x2a   : > { %s636_s29 = smov 128   ;;  %s637_s30 = smov 8  }
  0x2b   : > { %480 = dma.hbm_to_vmem [thread:$0]  (!%p735_p13), %s731_s4, 1024, %s739_s6, %s741_s8, %s636_s29, %s636_s29, %s637_s30  }
  0x2c   : > { %p449_p9 = scmp.ge.s32.totalorder %s633_s15, 1  ;;  %p156_p1 = scmp.lt.s32.totalorder %s633_s15, 3 }
  0x2e   : > { %p157_p3 = pnand %p449_p9, %p156_p1 }
  0x2f   : > { %s772_s5 = sand.u32 (!%p157_p3), 1, %s625_s13  }
  0x30   : > { %160 = sbr.rel (%p157_p3) target bundleno = 780 (0x30c), region = 32  ;;  %s450_s9 = sshll.u32 (!%p157_p3), %s772_s5, 6 }
  0x31   : > { %s163_s10 = scalar_lea.sflag (!%p157_p3), [#allocation3], %s772_s5  ;;  %s166_s11 = scalar_lea.vmem (!%p157_p3), [#allocation2], %s450_s9 }
  0x37   : > { %612 = dma.done.wait (%p711_p6), %s163_s10, 1024  }
  0x38   : > { %614 = vsyncadd (%p711_p6), %s163_s10, 4294966272  ;;  %vm197_vm0 = vcmask 130048   ;;  %v189_v0 = vld [vmem:[%s166_s11] sm:$0xff]  ;;  %v190_v1 = vld [vmem:[%s166_s11 + $0x8] sm:$0xff]  ;;  %vm242_vm1 = vcmask 1041409   ;;  %vm244_vm2 = vcmask 1042434  }
  0x39   : > { %v191_v2 = vld [vmem:[%s166_s11 + $0x10] sm:$0xff]  ;;  %v192_v3 = vld [vmem:[%s166_s11 + $0x18] sm:$0xff]  ;;  %v193_v4 = vld [vmem:[%s166_s11 + $0x20] sm:$0xff]  ;;  %v198_v6 = vsel %vm197_vm0, %v189_v0, 0.0  ;;  %v199_v7 = vsel %vm197_vm0, %v190_v1, 0.0  ;;  %vm246_vm3 = vcmask 1043459  }
  0x3a   : > { %v194_v5 = vld [vmem:[%s166_s11 + $0x28] sm:$0xff]  ;;  %v207_v8 = vsel %vm197_vm0, %v191_v2, 0.0  ;;  %v195_v9 = vld [vmem:[%s166_s11 + $0x30] sm:$0xff]  ;;  %v196_v10 = vld [vmem:[%s166_s11 + $0x38] sm:$0xff]  ;;  %v200_v11 = vadd.f32 %v199_v7, %v198_v6  ;;  %v208_v12 = vsel %vm197_vm0, %v192_v3, 0.0  ;;  %v216_v13 = vsel %vm197_vm0, %v193_v4, 0.0 }
  0x3b   : > { %v217_v14 = vsel %vm197_vm0, %v194_v5, 0.0  ;;  %v209_v15 = vadd.f32 %v208_v12, %v207_v8  ;;  %v225_v17 = vsel %vm197_vm0, %v195_v9, 0.0  ;;  %v226_v18 = vsel %vm197_vm0, %v196_v10, 0.0  ;;  %s638_s23 = smov 18   ;;  %s639_s4 = smov 17   ;;  %v251_v60 = vld [vmem:[%s849_s2] sm:$0xff] }
  0x3c   : > { %v218_v16 = vadd.f32 %v217_v14, %v216_v13  ;;  %v201_v19 = vrot.slane %v200_v11, 4  ;;  %v227_v20 = vadd.f32 %v226_v18, %v225_v17  ;;  %vm252_vm4 = vcmask 1047696   ;;  %s640_s6 = smov 16   ;;  %s645_s17 = smov 111   ;;  %v250_v5 = vld [vmem:[%s848_s1] sm:$0xff] }
  0x3d   : > { %v210_v21 = vrot.slane %v209_v15, 4  ;;  %v641_v57 = vmov 0.0|0.0   ;;  %vm642_vm5 = vmmov 0   ;;  %v643_v58 = vmov 0.0   ;;  %s451_s22 = sshll.u32 %s772_s5, 3  ;;  %s455_s26 = sshll.u32 %s689_s16, 7 }
  0x3e   : > { %v219_v22 = vrot.slane %v218_v16, 4  ;;  %v202_v23 = vadd.f32 %v201_v19, %v200_v11  ;;  %v228_v24 = vrot.slane %v227_v20, 4  ;;  %469 = vmatprep.subr.bf16.mxu0 %v641_v57  ;;  %466 = vmatprep.mubr.msk.f32.mxu0 %vm642_vm5, %v643_v58  ;;  %vm267_vm6 = vcmask 1043456   ;;  %s188_s27 = scalar_lea.vmem [#allocation5], %s451_s22  ;;  %s802_s9 = scalar_lea.hbm %s850_s3, %s455_s26 }
  0x3f   : > { %v211_v25 = vadd.f32 %v210_v21, %v209_v15  ;;  %v644_v61 = vmov 0   ;;  %vm646_vm7 = vmmov 1   ;;  %vm275_vm9 = vcmask 97280   ;;  %s373_s28 = sshll.u32 %s188_s27, 4  ;;  %s360_s10 = scalar_lea.sflag [#allocation4], %s772_s5  ;;  %s804_s28 = int_to_ptr.vmem [resolvable:$true] %s373_s28 }
  0x40   : > { %v220_v26 = vadd.f32 %v219_v22, %v218_v16  ;;  %v203_v27 = vrot.slane %v202_v23, 2  ;;  %v229_v28 = vadd.f32 %v228_v24, %v227_v20  ;;  %535 = vset.pattern.permute.xlu1 %v644_v61  ;;  %536 = vset.pattern.permute.xlu0 %v644_v61  ;;  %vm471_vm8 = vmpackc.low %vm267_vm6, %vm646_vm7  ;;  %s567_s11 = scalar_lea.vmem %s804_s28, 128  ;;  %p857_p11 = scmp.ne.s32.totalorder %s854_s24, 0 }
  0x41   : > { %v212_v29 = vrot.slane %v211_v25, 2  ;;  %p568_p6 = scmp.ne.s32.totalorder %s804_s28, %s567_s11  ;;  %s647_s16 = smov [#allocation5]  }
  0x42   : > { %v221_v30 = vrot.slane %v220_v26, 2  ;;  %v204_v31 = vadd.f32 %v203_v27, %v202_v23  ;;  %v230_v32 = vrot.slane %v229_v28, 2 }
  0x43   : > { %v213_v33 = vadd.f32 %v212_v29, %v211_v25  ;;  %p569_p12 = pnand %p568_p6, %p857_p11 }
  0x44   : > { %v222_v34 = vadd.f32 %v221_v30, %v220_v26  ;;  %v205_v35 = vrot.slane %v204_v31, 1  ;;  %v231_v36 = vadd.f32 %v230_v32, %v229_v28 }
  0x45   : > { %v214_v37 = vrot.slane %v213_v33, 1  ;;  %p570_p13 = pneg %p569_p12 }
  0x46   : > { %v223_v38 = vrot.slane %v222_v34, 1  ;;  %v206_v39 = vadd.f32 %v205_v35, %v204_v31  ;;  %v232_v40 = vrot.slane %v231_v36, 1 }
  0x47   : > { %v215_v41 = vadd.f32 %v214_v37, %v213_v33 }
  0x48   : > { %v224_v42 = vadd.f32 %v223_v38, %v222_v34  ;;  %v233_v43 = vadd.f32 %v232_v40, %v231_v36  ;;  %v234_v44 = vmul.f32 0.0625, %v206_v39 }
  0x49   : > { %v235_v45 = vmul.f32 0.0625, %v215_v41 }
  0x4a   : > { %v236_v46 = vmul.f32 0.0625, %v224_v42  ;;  %v237_v47 = vmul.f32 0.0625, %v233_v43 }
  0x4b   : > { %v243_v48 = vsel %vm242_vm1, %v235_v45, %v234_v44 }
  0x4c   : > { %v245_v49 = vsel %vm244_vm2, %v236_v46, %v243_v48 }
  0x4d   : > { %v247_v50 = vsel %vm246_vm3, %v237_v47, %v245_v49 }
  0x4e   : > { %v249_v51 = vsel %vm197_vm0, %v247_v50, 0.0 }
  0x4f   : > { %253 = vrot.lane.b32.xlu0 %v249_v51, %s638_s23  ;;  %v260_v52 = vrot.slane %v249_v51, 4 }
  0x51   : > { %261 = vrot.lane.b32.xlu1 %v260_v52, %s639_s4 }
  0xc1   : > { %v254_v53 = vpop.permute.xlu0 %253 }
  0xc2   : > { %v255_v54 = vsel %vm252_vm4, %v254_v53, %v249_v51 }
  0xc3   : > { %256 = vrot.lane.b32.xlu0 %v255_v54, %s638_s23  ;;  %v262_v59 = vpop.permute.xlu1 %261  ;;  %s571_s23 = sshll.u32 %s647_s16, 4  ;;  %s572_s23 = int_to_ptr.vmem [resolvable:$false] %s571_s23 }
  0xc4   : > { %s573_s4 = scalar_lea.vmem %s572_s23, 256  ;;  %p574_p8 = scmp.lt.s32.totalorder %s804_s28, %s572_s23 }
  0xc5   : > { %p575_p10 = scmp.lt.s32.totalorder %s573_s4, %s567_s11 }
  0xc7   : > { %p576_p0 = por %p575_p10, %p574_p8 }
  0xc9   : > { %p577_p2 = pnand %p576_p0, %p570_p13 }
 0x135   : > { %v257_v55 = vpop.permute.xlu0 %256 }
 0x136   : > { %v258_v56 = vsel %vm252_vm4, %v257_v55, %v249_v51 }
 0x137   : > { %265 = vrot.lane.b32.xlu1 %v258_v56, %s640_s6  ;;  %v268_v62 = vsel %vm267_vm6, %v258_v56, %v262_v59 }
 0x13b   : > { %353 = vperm.xlu1 %535, %v251_v60  }
 0x1a9   : > { %v266_v63 = vpop.permute.xlu1 %265 }
 0x1aa   : > { %v530_v0 = vpack.i.bf16 %v266_v63, %v268_v62 }
 0x1ac   : > { %531 = vrot.lane.b32.xlu0 %v530_v0, %s645_s17 }
 0x1ba   : > { %v354_v6 = vpop.permute.xlu1 %353 }
 0x21e   : > { %v532_v1 = vpop.permute.xlu0 %531 }
 0x21f   : > { %v534_v2 = vunpack.i.h.bf16 %v532_v1  ;;  %v533_v3 = vunpack.i.l.bf16 %v532_v1 }
 0x221   : > { %v470_v4 = vpack.c.bf16 %v534_v2, %v533_v3 }
 0x223   : > { %472 = vmatpush3.bf16.msk.msra.mxu0 %vm471_vm8, %v470_v4 }
 0x226   : > { %467 = vmatmul.mubr.msk.f32.vlgmr.msra.gmra.mrb[0].mxu0 %vm275_vm9, %v250_v5 }
 0x2f9   : > { %v347_v7 = vpop.f32.mrb[0].mxu0 }
 0x2fa   : > { %v356_v8 = vadd.f32 %v354_v6, %v347_v7  ;;  %v468_v9 = vpop.f32.mrb[1].mxu0 }
 0x2fc   : > { %v357_v10 = vmax.f32 %v356_v8, 0.0 }
 0x2fe   : > { %358 = vst.msk [vmem:[%s188_s27] sm:$0xff] %vm197_vm0, %v357_v10 }
 0x2ff   : > { %580 = shalt.err (!%p577_p2)
}
 0x300   : > { %s581_s5 = scalar_lea.hbm %s802_s9, 128  ;;  %s585_s8 = scalar_lea.hbm %s850_s3, 256 }
 0x301   : > { %p582_p4 = scmp.ne.s32.totalorder %s802_s9, %s581_s5  ;;  %p586_p9 = scmp.lt.u32.totalorder %s802_s9, %s850_s3 }
 0x302   : > { %p587_p1 = scmp.lt.u32.totalorder %s585_s8, %s581_s5  ;;  %p589_p6 = scmp.lt.u32.totalorder %s581_s5, %s802_s9 }
 0x303   : > { %p583_p5 = pnand %p582_p4, %p857_p11 }
 0x304   : > { %p588_p3 = por %p587_p1, %p586_p9 }
 0x305   : > { %p584_p7 = pneg %p583_p5 }
 0x306   : > { %p590_p12 = por %p589_p6, %p588_p3 }
 0x308   : > { %p591_p13 = pnand %p590_p12, %p584_p7 }
 0x30a   : > { %594 = shalt.err (!%p591_p13)
}
 0x30b   : > { %475 = dma.vmem_to_hbm [thread:$0]  (%p857_p11), %s804_s28, 128, %s802_s9, %s360_s10  }
 0x30c PF: > { %s385_s20 = sand.u32 1, %s621_s12   ;;  %p858_p8 = scmp.ne.s32.totalorder %s855_s25, 0 }
 0x30d   : > { %p859_p10 = scmp.ge.s32.totalorder %s633_s15, 2  ;;  %s386_s22 = scalar_lea.sflag [#allocation4], %s385_s20 }
 0x30f   : > { %p482_p0 = pnand %p859_p10, %p858_p8 }
 0x311   : > { %616 = dma.done.wait (!%p482_p0), %s386_s22, 128  }
 0x312   : > { %618 = vsyncadd (!%p482_p0), %s386_s22, 4294967168  ;;  %p16_p2 = scmp.ge.s32.totalorder %s693_s18, 4   ;;  %s860_s12 = smov %s625_s13 }
 0x313   : > { %s861_s13 = smov %s629_s14  ;;  %s862_s14 = smov %s705_s21 }
 0x314   : > { %s863_s15 = smov %s693_s18  ;;  %18 = sbr.rel (!%p16_p2) target bundleno = 5 (0x5), region = 77 }
 0x31b   :  { %391 = vsyncpa [#allocation3], 1 }
 0x31c   :  { %393 = vsyncpa [#allocation3 + $0x1], 1 }
 0x31d   :  { %394 = vsyncpa [#allocation4], 1 }
 0x31e   :  { %396 = vsyncpa [#allocation4 + $0x1], 1 }

</bundles_post_ra>
